<compile_context>
chip_gen: v6e
topology: v6e:2x2x1
jax: 0.10.0
libtpu: 0.0.40
codegen_flags: <defaults>
</compile_context>

<pallas_src>
import functools

import jax
import jax.numpy as jnp
from jax.experimental import pallas as pl
from jax.experimental.pallas import tpu as pltpu


def _round_up(n, m):
    return (n + m - 1) // m * m


def rnn_recurrent_kernel(xw_ref, whh_ref, wfc_ref, bfc_ref, out_ref, h_ref):
    # xw_ref  : (U, B_tile, H)   time-major pre-activations for U timesteps
    # whh_ref : (H, H)           W_hh^T   (constant index map -> VMEM resident)
    # wfc_ref : (H, O_pad)       W_fc^T, lane-padded to 128
    # bfc_ref : (1, O_pad)       b_fc (f32)
    # out_ref : (B_tile, O_pad)  f32 logits for this batch tile
    # h_ref   : (B_tile, H)      f32 hidden-state carry (VMEM scratch)
    t = pl.program_id(1)

    @pl.when(t == 0)
    def _init():
        h_ref[...] = jnp.zeros_like(h_ref)

    whh = whh_ref[...]
    h = h_ref[...]
    u_steps = xw_ref.shape[0]
    # Static unroll of the recurrent chain; bias is already folded into xw.
    # Mosaic hoists the loop-invariant W_hh RHS push; explicit weight-stationary
    # MXU driving (matmul_push_rhs) was not needed at this size.
    for u in range(u_steps):
        pre = xw_ref[u].astype(jnp.float32) + jnp.dot(
            h.astype(whh.dtype), whh, preferred_element_type=jnp.float32)
        h = jnp.maximum(pre, 0.0)
    h_ref[...] = h

    @pl.when(t == pl.num_programs(1) - 1)
    def _finalize():
        wfc = wfc_ref[...]
        out_ref[...] = (
            jnp.dot(h.astype(wfc.dtype), wfc, preferred_element_type=jnp.float32)
            + bfc_ref[...]
        )


@functools.partial(jax.jit,
                   static_argnames=("param_dtype", "batch_tile", "time_unroll"))
def rnn_imc_forward(x, params, *, param_dtype=jnp.float32, batch_tile=128,
                    time_unroll=None):
    """x: (B, T, D) float, batch-first. Returns (B, output_dim) float32 logits."""
    w_ih, w_hh, b_ih, b_hh, w_fc, b_fc = params
    B, T, D = x.shape
    H = w_hh.shape[0]
    O = w_fc.shape[0]
    f32 = jnp.float32
    cdt = param_dtype                     # MXU operand dtype (bf16 on v6e/v7x)

    # ---- tiling decisions ---------------------------------------------------
    b_tile = min(batch_tile, _round_up(B, 8))     # >= sublane, <= 128 rows/step
    b_pad = _round_up(B, b_tile)
    nb = b_pad // b_tile
    if time_unroll is None:
        time_unroll = next(u for u in (4, 2, 1) if T % u == 0)
    u_steps = time_unroll
    assert T % u_steps == 0, "time_unroll must divide T"
    nt = T // u_steps
    o_pad = _round_up(O, 128)                     # lane-dense FC output store

    # ---- one-time weight prep ------------------------------------------------
    wih_t = w_ih.T.astype(cdt)                                         # (D, H)
    whh_t = w_hh.T.astype(cdt)                                         # (H, H)
    wfc_t = jnp.zeros((H, o_pad), cdt).at[:, :O].set(w_fc.T.astype(cdt))
    bfc = jnp.zeros((1, o_pad), f32).at[:, :O].set(b_fc.astype(f32))
    bias = (b_ih + b_hh).astype(f32).reshape(1, 1, H)                  # folded

    x_p = x.astype(cdt)
    if b_pad != B:
        x_p = jnp.pad(x_p, ((0, b_pad - B), (0, 0), (0, 0)))

    # ---- hoisted input projection: one big matmul, off the serial chain ------
    # Produces the time-major pre-activation stream directly (no transpose pass).
    xw = (jnp.einsum("btd,dh->tbh", x_p, wih_t,
                     preferred_element_type=f32) + bias).astype(cdt)   # (T,Bp,H)

    # ---- explicit VMEM budget (sized for v7x's 64 MiB VMEM) ------------------
    isz = jnp.dtype(cdt).itemsize
    per_step = (2 * u_steps * b_tile * H * isz        # double-buffered xw stream
                + 2 * H * H * isz                     # W_hh^T
                + 2 * H * o_pad * isz + 2 * o_pad * 4 # W_fc^T, b_fc
                + 2 * b_tile * o_pad * 4              # output block
                + b_tile * H * 4)                     # h carry scratch
    vmem_limit = int(min(max(2 * per_step, 4 << 20), 48 << 20))

    out = pl.pallas_call(
        rnn_recurrent_kernel,
        out_shape=jax.ShapeDtypeStruct((b_pad, o_pad), f32),
        grid_spec=pltpu.PrefetchScalarGridSpec(
            num_scalar_prefetch=0,
            grid=(nb, nt),
            in_specs=[
                pl.BlockSpec((u_steps, b_tile, H), lambda b, t: (t, b, 0)),  # xw
                pl.BlockSpec((H, H), lambda b, t: (0, 0)),                   # W_hh^T
                pl.BlockSpec((H, o_pad), lambda b, t: (0, 0)),               # W_fc^T
                pl.BlockSpec((1, o_pad), lambda b, t: (0, 0)),               # b_fc
            ],
            out_specs=pl.BlockSpec((b_tile, o_pad), lambda b, t: (b, 0)),
            scratch_shapes=[pltpu.VMEM((b_tile, H), f32)],
        ),
        compiler_params=pltpu.CompilerParams(
            dimension_semantics=("parallel", "arbitrary"),
            vmem_limit_bytes=vmem_limit,
        ),
    )(xw, whh_t, wfc_t, bfc)
    return out[:B, :O]


def init_params(key, input_dim, hidden_dim, output_dim):
    """Deterministic init mimicking PyTorch's U(-1/sqrt(H), 1/sqrt(H))."""
    ks = jax.random.split(key, 6)
    s = 1.0 / jnp.sqrt(hidden_dim)
    w_ih = jax.random.uniform(ks[0], (hidden_dim, input_dim), jnp.float32, -s, s)
    w_hh = jax.random.uniform(ks[1], (hidden_dim, hidden_dim), jnp.float32, -s, s)
    b_ih = jax.random.uniform(ks[2], (hidden_dim,), jnp.float32, -s, s)
    b_hh = jax.random.uniform(ks[3], (hidden_dim,), jnp.float32, -s, s)
    w_fc = jax.random.uniform(ks[4], (output_dim, hidden_dim), jnp.float32, -s, s)
    b_fc = jax.random.uniform(ks[5], (output_dim,), jnp.float32, -s, s)
    return w_ih, w_hh, b_ih, b_hh, w_fc, b_fc


def reference_forward(x, params):
    """Pure-JAX reference matching PyTorch nn.RNN(relu, batch_first) + Linear."""
    w_ih, w_hh, b_ih, b_hh, w_fc, b_fc = params
    B, T, D = x.shape
    H = w_hh.shape[0]
    h = jnp.zeros((B, H), jnp.float32)
    for t in range(T):
        h = jax.nn.relu(x[:, t, :] @ w_ih.T + b_ih + h @ w_hh.T + b_hh)
    return h @ w_fc.T + b_fc


if __name__ == "__main__":
    input_dim = 28     # pixels per FashionMNIST row
    hidden_dim = 128
    output_dim = 10
    batch = 4
    seq = 8            # small sequence length for the demo

    key = jax.random.PRNGKey(0)
    kx, kp = jax.random.split(key)
    x = jax.random.normal(kx, (batch, seq, input_dim), dtype=jnp.float32)
    params = init_params(kp, input_dim, hidden_dim, output_dim)

    ref = reference_forward(x, params)

    # f32 path (tight tolerance vs reference)
    out = jax.block_until_ready(rnn_imc_forward(x, params))
    assert out.shape == (batch, output_dim)
    assert jnp.allclose(out, ref, atol=1e-4, rtol=1e-4), "f32 kernel mismatch vs reference"

    # bf16-weight path (recommended on v6e/v7x: full-rate MXU, half the DMA bytes;
    # carry/relu/accumulation remain f32). Looser tolerance per bf16 rounding.
    out_bf16 = jax.block_until_ready(
        rnn_imc_forward(x, params, param_dtype=jnp.bfloat16))
    assert out_bf16.shape == (batch, output_dim)
    assert jnp.allclose(out_bf16, ref, atol=1e-1, rtol=1e-1), "bf16 kernel mismatch vs reference"

    print("KERNEL_OK")
</pallas_src>

<mosaic_0001>
module attributes {stable_mosaic.version = 11 : i64} {
  func.func @rnn_recurrent_kernel(%arg0: i32, %arg1: i32, %arg2: memref<4x8x128xf32, #tpu.memory_space<vmem>>, %arg3: memref<128x128xf32, #tpu.memory_space<vmem>>, %arg4: memref<128x128xf32, #tpu.memory_space<vmem>>, %arg5: memref<1x128xf32, #tpu.memory_space<vmem>>, %arg6: memref<8x128xf32, #tpu.memory_space<vmem>>, %arg7: memref<8x128xf32, #tpu.memory_space<vmem>>) attributes {dimension_semantics = [#tpu.dimension_semantics<parallel>, #tpu.dimension_semantics<arbitrary>], iteration_bounds = array<i64: 1, 2>, scalar_prefetch = 0 : i64, scratch_operands = 1 : i64, tpu.core_type = #tpu.core_type<tc>, window_params = [{transform_indices = @transform_0, window_bounds = array<i64: 4, 8, 128>}, {pipeline_mode = #tpu.pipeline_mode<synchronous>, transform_indices = @transform_1, window_bounds = array<i64: 128, 128>}, {pipeline_mode = #tpu.pipeline_mode<synchronous>, transform_indices = @transform_2, window_bounds = array<i64: 128, 128>}, {pipeline_mode = #tpu.pipeline_mode<synchronous>, transform_indices = @transform_3, window_bounds = array<i64: 1, 128>}, {transform_indices = @transform_4, window_bounds = array<i64: 8, 128>}]} {
    %c0_i32 = arith.constant 0 : i32
    %0 = arith.cmpi eq, %arg1, %c0_i32 : i32
    %1 = arith.extui %0 : i1 to i32
    %c0_i32_0 = arith.constant 0 : i32
    %2 = arith.cmpi ne, %1, %c0_i32_0 : i32
    scf.if %2 {
      %cst_23 = arith.constant 0.000000e+00 : f32
      %33 = vector.broadcast %cst_23 : f32 to vector<8x128xf32>
      %c0_24 = arith.constant 0 : index
      %c0_25 = arith.constant 0 : index
      %34 = vector.load %arg7[%c0_24, %c0_25] : memref<8x128xf32, #tpu.memory_space<vmem>>, vector<8x128xf32>
      tpu.vector_store %arg7[%c0_24, %c0_25], %33 {strides = array<i32>} : memref<8x128xf32, #tpu.memory_space<vmem>>, vector<8x128xf32>,
    } else {
    }
    %c0 = arith.constant 0 : index
    %c0_1 = arith.constant 0 : index
    %3 = vector.load %arg3[%c0, %c0_1] : memref<128x128xf32, #tpu.memory_space<vmem>>, vector<128x128xf32>
    %c0_2 = arith.constant 0 : index
    %c0_3 = arith.constant 0 : index
    %4 = vector.load %arg7[%c0_2, %c0_3] : memref<8x128xf32, #tpu.memory_space<vmem>>, vector<8x128xf32>
    %c0_4 = arith.constant 0 : index
    %c0_5 = arith.constant 0 : index
    %c0_6 = arith.constant 0 : index
    %5 = vector.load %arg2[%c0_4, %c0_5, %c0_6] : memref<4x8x128xf32, #tpu.memory_space<vmem>>, vector<1x8x128xf32>
    %6 = vector.shape_cast %5 : vector<1x8x128xf32> to vector<8x128xf32>
    %cst = arith.constant dense<0.000000e+00> : vector<8x128xf32>
    %7 = tpu.matmul %4, %3, %cst {dimension_numbers = #tpu.dot_dimension_numbers<[1], [0], [0], [1], [0, 0, 1, 1], [], []>} : vector<8x128xf32>, vector<128x128xf32>, vector<8x128xf32> -> vector<8x128xf32>
    %8 = arith.addf %6, %7 : vector<8x128xf32>
    %cst_7 = arith.constant 0.000000e+00 : f32
    %9 = vector.broadcast %cst_7 : f32 to vector<8x128xf32>
    %10 = arith.maximumf %8, %9 : vector<8x128xf32>
    %c1 = arith.constant 1 : index
    %c0_8 = arith.constant 0 : index
    %c0_9 = arith.constant 0 : index
    %11 = vector.load %arg2[%c1, %c0_8, %c0_9] : memref<4x8x128xf32, #tpu.memory_space<vmem>>, vector<1x8x128xf32>
    %12 = vector.shape_cast %11 : vector<1x8x128xf32> to vector<8x128xf32>
    %cst_10 = arith.constant dense<0.000000e+00> : vector<8x128xf32>
    %13 = tpu.matmul %10, %3, %cst_10 {dimension_numbers = #tpu.dot_dimension_numbers<[1], [0], [0], [1], [0, 0, 1, 1], [], []>} : vector<8x128xf32>, vector<128x128xf32>, vector<8x128xf32> -> vector<8x128xf32>
    %14 = arith.addf %12, %13 : vector<8x128xf32>
    %cst_11 = arith.constant 0.000000e+00 : f32
    %15 = vector.broadcast %cst_11 : f32 to vector<8x128xf32>
    %16 = arith.maximumf %14, %15 : vector<8x128xf32>
    %c2 = arith.constant 2 : index
    %c0_12 = arith.constant 0 : index
    %c0_13 = arith.constant 0 : index
    %17 = vector.load %arg2[%c2, %c0_12, %c0_13] : memref<4x8x128xf32, #tpu.memory_space<vmem>>, vector<1x8x128xf32>
    %18 = vector.shape_cast %17 : vector<1x8x128xf32> to vector<8x128xf32>
    %cst_14 = arith.constant dense<0.000000e+00> : vector<8x128xf32>
    %19 = tpu.matmul %16, %3, %cst_14 {dimension_numbers = #tpu.dot_dimension_numbers<[1], [0], [0], [1], [0, 0, 1, 1], [], []>} : vector<8x128xf32>, vector<128x128xf32>, vector<8x128xf32> -> vector<8x128xf32>
    %20 = arith.addf %18, %19 : vector<8x128xf32>
    %cst_15 = arith.constant 0.000000e+00 : f32
    %21 = vector.broadcast %cst_15 : f32 to vector<8x128xf32>
    %22 = arith.maximumf %20, %21 : vector<8x128xf32>
    %c3 = arith.constant 3 : index
    %c0_16 = arith.constant 0 : index
    %c0_17 = arith.constant 0 : index
    %23 = vector.load %arg2[%c3, %c0_16, %c0_17] : memref<4x8x128xf32, #tpu.memory_space<vmem>>, vector<1x8x128xf32>
    %24 = vector.shape_cast %23 : vector<1x8x128xf32> to vector<8x128xf32>
    %cst_18 = arith.constant dense<0.000000e+00> : vector<8x128xf32>
    %25 = tpu.matmul %22, %3, %cst_18 {dimension_numbers = #tpu.dot_dimension_numbers<[1], [0], [0], [1], [0, 0, 1, 1], [], []>} : vector<8x128xf32>, vector<128x128xf32>, vector<8x128xf32> -> vector<8x128xf32>
    %26 = arith.addf %24, %25 : vector<8x128xf32>
    %cst_19 = arith.constant 0.000000e+00 : f32
    %27 = vector.broadcast %cst_19 : f32 to vector<8x128xf32>
    %28 = arith.maximumf %26, %27 : vector<8x128xf32>
    %c0_20 = arith.constant 0 : index
    %c0_21 = arith.constant 0 : index
    %29 = vector.load %arg7[%c0_20, %c0_21] : memref<8x128xf32, #tpu.memory_space<vmem>>, vector<8x128xf32>
    tpu.vector_store %arg7[%c0_20, %c0_21], %28 {strides = array<i32>} : memref<8x128xf32, #tpu.memory_space<vmem>>, vector<8x128xf32>,
    %c1_i32 = arith.constant 1 : i32
    %30 = arith.cmpi eq, %arg1, %c1_i32 : i32
    %31 = arith.extui %30 : i1 to i32
    %c0_i32_22 = arith.constant 0 : i32
    %32 = arith.cmpi ne, %31, %c0_i32_22 : i32
    scf.if %32 {
      %c0_23 = arith.constant 0 : index
      %c0_24 = arith.constant 0 : index
      %33 = vector.load %arg4[%c0_23, %c0_24] : memref<128x128xf32, #tpu.memory_space<vmem>>, vector<128x128xf32>
      %cst_25 = arith.constant dense<0.000000e+00> : vector<8x128xf32>
      %34 = tpu.matmul %28, %33, %cst_25 {dimension_numbers = #tpu.dot_dimension_numbers<[1], [0], [0], [1], [0, 0, 1, 1], [], []>} : vector<8x128xf32>, vector<128x128xf32>, vector<8x128xf32> -> vector<8x128xf32>
      %c0_26 = arith.constant 0 : index
      %c0_27 = arith.constant 0 : index
      %35 = vector.load %arg5[%c0_26, %c0_27] : memref<1x128xf32, #tpu.memory_space<vmem>>, vector<1x128xf32>
      %36 = vector.broadcast %35 : vector<1x128xf32> to vector<8x128xf32>
      %37 = arith.addf %34, %36 : vector<8x128xf32>
      %c0_28 = arith.constant 0 : index
      %c0_29 = arith.constant 0 : index
      %38 = vector.load %arg6[%c0_28, %c0_29] : memref<8x128xf32, #tpu.memory_space<vmem>>, vector<8x128xf32>
      tpu.vector_store %arg6[%c0_28, %c0_29], %37 {strides = array<i32>} : memref<8x128xf32, #tpu.memory_space<vmem>>, vector<8x128xf32>,
    } else {
    }
    return
  }
  func.func @transform_0(%arg0: i32, %arg1: i32) -> (i32, i32, i32) {
    %c0_i32 = arith.constant 0 : i32
    %c0_i32_0 = arith.constant 0 : i32
    return %arg1, %arg0, %c0_i32 : i32, i32, i32
  }
  func.func @transform_1(%arg0: i32, %arg1: i32) -> (i32, i32) {
    %c0_i32 = arith.constant 0 : i32
    %c0_i32_0 = arith.constant 0 : i32
    %c0_i32_1 = arith.constant 0 : i32
    return %c0_i32, %c0_i32_0 : i32, i32
  }
  func.func @transform_2(%arg0: i32, %arg1: i32) -> (i32, i32) {
    %c0_i32 = arith.constant 0 : i32
    %c0_i32_0 = arith.constant 0 : i32
    %c0_i32_1 = arith.constant 0 : i32
    return %c0_i32, %c0_i32_0 : i32, i32
  }
  func.func @transform_3(%arg0: i32, %arg1: i32) -> (i32, i32) {
    %c0_i32 = arith.constant 0 : i32
    %c0_i32_0 = arith.constant 0 : i32
    %c0_i32_1 = arith.constant 0 : i32
    return %c0_i32, %c0_i32_0 : i32, i32
  }
  func.func @transform_4(%arg0: i32, %arg1: i32) -> (i32, i32) {
    %c0_i32 = arith.constant 0 : i32
    %c0_i32_0 = arith.constant 0 : i32
    return %arg0, %c0_i32 : i32, i32
  }
}

</mosaic_0001>

<bundles_post_ra>
// kernel: rnn_imc_forward.1
= control target key start
LH: loop header
LB: loop body
LE: loop exit
PB: predicated region body
PF: predicated region fallthrough
CT: control target
= control target key end

     0   :  { %s1057_s15 = smov 0   ;;  %s1059_s16 = smov 0   ;;  %s1368_s0 = inlined_call_operand.vmem [shape: f32[8,8,128], index: 0, kind: input, shape index: {}]   ;;  %s1369_s1 = inlined_call_operand.vmem [shape: f32[128,128], index: 1, kind: input, shape index: {}]   ;;  %s1370_s2 = inlined_call_operand.vmem [shape: f32[128,128], index: 2, kind: input, shape index: {}]   ;;  %s1371_s3 = inlined_call_operand.vmem [shape: f32[1,128], index: 3, kind: input, shape index: {}]   ;;  %s1372_s4 = inlined_call_operand.vmem [shape: f32[8,128], index: 4, kind: output, shape index: {}]  }
   0x1   :  { %s1061_s17 = smov 0  }
   0x2 LB: > { %s23_s18 = sadd.s32 1, %s1021_s16  ;;  %p702_p0 = scmp.ge.s32.totalorder %s1025_s17, 1  ;;  %s1025_s17 = sphi %s1061_s17, %s14_s17   ;;  %s1021_s16 = sphi %s1059_s16, %s1374_s16   ;;  %s1017_s15 = sphi %s1057_s15, %s1373_s15  }
   0x3   : > { %p24_p1 = scmp.ge.s32.totalorder %s23_s18, 2  ;;  %p180_p2 = scmp.lt.s32.totalorder %s1025_s17, 3 }
   0x5   : > { %s1376_s18 = smov (%p24_p1, %s23_s18), 0  ;;  %p181_p3 = pnand %p702_p0, %p180_p2 }
   0x6   : > { %s703_s19 = sshll.u32 (!%p181_p3), %s1017_s15, 2  ;;  %p705_p5 = scmp.ne.s32.totalorder (!%p181_p3), %s1017_s15, 0 }
   0x7   : > { %184 = sbr.rel (%p181_p3) target bundleno = 1070 (0x42e), region = 36  ;;  %p209_p4 = scmp.lt.s32.totalorder (!%p181_p3), %s703_s19, 7 }
   0xc   : > { %s1378_s19 = smov (!%p209_p4, %s703_s19), 7  ;;  %224 = sbr.rel (%p705_p5) target bundleno = 19 (0x13), region = 40 }
   0xd   : > { %s704_s20 = sshll.u32 %s1378_s19, 3 }
   0xe   : > { %s1081_s23 = scalar_lea.vmem %s1368_s0, %s704_s20 }
  0x11   : > { %v1027_v0 = vmov 0.0  }
  0x12   : > { %225 = vst [vmem:[#allocation2] sm:$0xff] %v1027_v0 }
  0x13 PF: > { %v1087_v1 = vld [vmem:[%s1369_s1 + $0x78] sm:$0xff]  ;;  %v1028_v2 = vmov 0.0   ;;  %v1093_v3 = vld [vmem:[%s1369_s1 + $0x70] sm:$0xff]  ;;  %vm1029_vm0 = vmmov 0   ;;  %v1103_v4 = vld [vmem:[%s1369_s1 + $0x68] sm:$0xff]  ;;  %p709_p6 = scmp.ne.s32.totalorder %s1017_s15, 1 }
  0x14   : > { %799 = vmatprep.subr.mxu0 %v1028_v2  ;;  %831 = vmatprep.mubr.msk.f32.mxu0 %vm1029_vm0, %v1028_v2  ;;  %v1112_v5 = vld [vmem:[%s1369_s1 + $0x60] sm:$0xff]  ;;  %v1121_v6 = vld [vmem:[%s1369_s1 + $0x58] sm:$0xff]  ;;  %v1130_v7 = vld [vmem:[%s1369_s1 + $0x50] sm:$0xff] }
  0x15   : > { %800 = vmatpush3.msra.mxu0 %v1087_v1  ;;  %834 = vmatprep.subr.mxu1 %v1028_v2  ;;  %v1139_v8 = vld [vmem:[%s1369_s1 + $0x48] sm:$0xff]  ;;  %v1148_v9 = vld [vmem:[%s1369_s1 + $0x40] sm:$0xff]  ;;  %v1157_v10 = vld [vmem:[%s1369_s1 + $0x38] sm:$0xff] }
  0x16   : > { %801 = vmatprep.subr.mxu0 %v1028_v2  ;;  %835 = vmatpush3.msra.mxu1 %v1087_v1  ;;  %v1166_v11 = vld [vmem:[%s1369_s1 + $0x30] sm:$0xff]  ;;  %v1175_v12 = vld [vmem:[%s1369_s1 + $0x28] sm:$0xff]  ;;  %v1184_v13 = vld [vmem:[%s1369_s1 + $0x20] sm:$0xff] }
  0x17   : > { %802 = vmatpush3.msra.mxu0 %v1093_v3  ;;  %836 = vmatprep.subr.mxu1 %v1028_v2  ;;  %v1193_v14 = vld [vmem:[%s1369_s1 + $0x18] sm:$0xff]  ;;  %v1202_v15 = vld [vmem:[%s1369_s1 + $0x10] sm:$0xff]  ;;  %v1211_v16 = vld [vmem:[%s1369_s1 + $0x8] sm:$0xff] }
  0x18   : > { %803 = vmatprep.subr.mxu0 %v1028_v2  ;;  %837 = vmatpush3.msra.mxu1 %v1093_v3  ;;  %v1220_v17 = vld [vmem:[%s1369_s1] sm:$0xff]  ;;  %v706_v24 = vld [vmem:[%s1081_s23 + $0x8] sm:$0xff]  ;;  %v707_v29 = vld [vmem:[%s1081_s23 + $0x10] sm:$0xff] }
  0x19   : > { %804 = vmatpush3.msra.mxu0 %v1103_v4  ;;  %838 = vmatprep.subr.mxu1 %v1028_v2  ;;  %v242_v18 = vld [vmem:[#allocation2] sm:$0xff]  ;;  %v708_v34 = vld [vmem:[%s1081_s23 + $0x18] sm:$0xff] }
  0x1a   : > { %805 = vmatprep.subr.mxu0 %v1028_v2  ;;  %839 = vmatpush3.msra.mxu1 %v1103_v4  ;;  %v243_v19 = vld [vmem:[%s1081_s23] sm:$0xff] }
  0x1b   : > { %806 = vmatpush3.msra.mxu0 %v1112_v5  ;;  %840 = vmatprep.subr.mxu1 %v1028_v2 }
  0x1c   : > { %807 = vmatprep.subr.mxu0 %v1028_v2  ;;  %841 = vmatpush3.msra.mxu1 %v1112_v5 }
  0x1d   : > { %808 = vmatpush3.msra.mxu0 %v1121_v6  ;;  %842 = vmatprep.subr.mxu1 %v1028_v2 }
  0x1e   : > { %809 = vmatprep.subr.mxu0 %v1028_v2  ;;  %843 = vmatpush3.msra.mxu1 %v1121_v6 }
  0x1f   : > { %810 = vmatpush3.msra.mxu0 %v1130_v7  ;;  %844 = vmatprep.subr.mxu1 %v1028_v2 }
  0x20   : > { %811 = vmatprep.subr.mxu0 %v1028_v2  ;;  %845 = vmatpush3.msra.mxu1 %v1130_v7 }
  0x21   : > { %812 = vmatpush3.msra.mxu0 %v1139_v8  ;;  %846 = vmatprep.subr.mxu1 %v1028_v2 }
  0x22   : > { %813 = vmatprep.subr.mxu0 %v1028_v2  ;;  %847 = vmatpush3.msra.mxu1 %v1139_v8 }
  0x23   : > { %814 = vmatpush3.msra.mxu0 %v1148_v9  ;;  %848 = vmatprep.subr.mxu1 %v1028_v2 }
  0x24   : > { %815 = vmatprep.subr.mxu0 %v1028_v2  ;;  %849 = vmatpush3.msra.mxu1 %v1148_v9 }
  0x25   : > { %816 = vmatpush3.msra.mxu0 %v1157_v10  ;;  %850 = vmatprep.subr.mxu1 %v1028_v2 }
  0x26   : > { %817 = vmatprep.subr.mxu0 %v1028_v2  ;;  %851 = vmatpush3.msra.mxu1 %v1157_v10 }
  0x27   : > { %818 = vmatpush3.msra.mxu0 %v1166_v11  ;;  %852 = vmatprep.subr.mxu1 %v1028_v2 }
  0x28   : > { %819 = vmatprep.subr.mxu0 %v1028_v2  ;;  %853 = vmatpush3.msra.mxu1 %v1166_v11 }
  0x29   : > { %820 = vmatpush3.msra.mxu0 %v1175_v12  ;;  %854 = vmatprep.subr.mxu1 %v1028_v2 }
  0x2a   : > { %821 = vmatprep.subr.mxu0 %v1028_v2  ;;  %855 = vmatpush3.msra.mxu1 %v1175_v12 }
  0x2b   : > { %822 = vmatpush3.msra.mxu0 %v1184_v13  ;;  %856 = vmatprep.subr.mxu1 %v1028_v2 }
  0x2c   : > { %823 = vmatprep.subr.mxu0 %v1028_v2  ;;  %857 = vmatpush3.msra.mxu1 %v1184_v13 }
  0x2d   : > { %824 = vmatpush3.msra.mxu0 %v1193_v14  ;;  %858 = vmatprep.subr.mxu1 %v1028_v2 }
  0x2e   : > { %825 = vmatprep.subr.mxu0 %v1028_v2  ;;  %859 = vmatpush3.msra.mxu1 %v1193_v14 }
  0x2f   : > { %826 = vmatpush3.msra.mxu0 %v1202_v15  ;;  %860 = vmatprep.subr.mxu1 %v1028_v2 }
  0x30   : > { %827 = vmatprep.subr.mxu0 %v1028_v2  ;;  %861 = vmatpush3.msra.mxu1 %v1202_v15 }
  0x31   : > { %828 = vmatpush3.msra.mxu0 %v1211_v16  ;;  %862 = vmatprep.subr.mxu1 %v1028_v2 }
  0x32   : > { %829 = vmatprep.subr.mxu0 %v1028_v2  ;;  %863 = vmatpush3.msra.mxu1 %v1211_v16 }
  0x33   : > { %830 = vmatpush3.msra.mxu0 %v1220_v17  ;;  %864 = vmatprep.subr.mxu1 %v1028_v2 }
  0x34   : > { %832 = vmatmul.mubr.f32.vlgmr.msra.gmra.mxu0 %v242_v18  ;;  %865 = vmatpush3.msra.mxu1 %v1220_v17 }
  0x35   : > { %866 = vmatprep.mubr.msk.f32.mxu1 %vm1029_vm0, %v1028_v2  ;;  %869 = vmatprep.subr.mxu0 %v1028_v2 }
  0x36   : > { %870 = vmatpush3.msra.mxu0 %v1087_v1  ;;  %901 = vmatprep.mubr.msk.f32.mxu0 %vm1029_vm0, %v1028_v2 }
  0x37   : > { %871 = vmatprep.subr.mxu0 %v1028_v2  ;;  %904 = vmatprep.subr.mxu1 %v1028_v2 }
  0x38   : > { %872 = vmatpush3.msra.mxu0 %v1093_v3 }
  0x39   : > { %873 = vmatprep.subr.mxu0 %v1028_v2 }
  0x3a   : > { %874 = vmatpush3.msra.mxu0 %v1103_v4 }
  0x3b   : > { %875 = vmatprep.subr.mxu0 %v1028_v2 }
  0x3c   : > { %876 = vmatpush3.msra.mxu0 %v1112_v5 }
  0x3d   : > { %877 = vmatprep.subr.mxu0 %v1028_v2 }
  0x3e   : > { %878 = vmatpush3.msra.mxu0 %v1121_v6 }
  0x3f   : > { %879 = vmatprep.subr.mxu0 %v1028_v2 }
  0x40   : > { %880 = vmatpush3.msra.mxu0 %v1130_v7 }
  0x41   : > { %881 = vmatprep.subr.mxu0 %v1028_v2 }
  0x42   : > { %882 = vmatpush3.msra.mxu0 %v1139_v8 }
  0x43   : > { %883 = vmatprep.subr.mxu0 %v1028_v2 }
  0x44   : > { %884 = vmatpush3.msra.mxu0 %v1148_v9 }
  0x45   : > { %885 = vmatprep.subr.mxu0 %v1028_v2 }
  0x46   : > { %886 = vmatpush3.msra.mxu0 %v1157_v10 }
  0x47   : > { %887 = vmatprep.subr.mxu0 %v1028_v2 }
  0x48   : > { %888 = vmatpush3.msra.mxu0 %v1166_v11 }
  0x49   : > { %889 = vmatprep.subr.mxu0 %v1028_v2 }
  0x4a   : > { %890 = vmatpush3.msra.mxu0 %v1175_v12 }
  0x4b   : > { %891 = vmatprep.subr.mxu0 %v1028_v2 }
  0x4c   : > { %892 = vmatpush3.msra.mxu0 %v1184_v13 }
  0x4d   : > { %893 = vmatprep.subr.mxu0 %v1028_v2 }
  0x4e   : > { %894 = vmatpush3.msra.mxu0 %v1193_v14 }
  0x4f   : > { %895 = vmatprep.subr.mxu0 %v1028_v2 }
  0x50   : > { %896 = vmatpush3.msra.mxu0 %v1202_v15 }
  0x51   : > { %897 = vmatprep.subr.mxu0 %v1028_v2 }
  0x52   : > { %898 = vmatpush3.msra.mxu0 %v1211_v16 }
  0x53   : > { %899 = vmatprep.subr.mxu0 %v1028_v2 }
  0x54   : > { %900 = vmatpush3.msra.mxu0 %v1220_v17 }
  0xf4   : > { %v310_v20 = vpop.f32.mrf.mxu0 }
  0xf5   : > { %v314_v21 = vadd.f32 %v310_v20, %v243_v19 }
  0xf6   : > { %v833_v22 = vpop.f32.mrf.mxu0 }
  0xf7   : > { %v315_v23 = vmax.f32 %v314_v21, 0.0 }
  0xf9   : > { %867 = vmatmul.mubr.f32.vlgmr.msra.gmra.mxu1 %v315_v23 }
  0xfa   : > { %905 = vmatpush3.msra.mxu1 %v1087_v1  ;;  %936 = vmatprep.mubr.msk.f32.mxu1 %vm1029_vm0, %v1028_v2 }
  0xfb   : > { %906 = vmatprep.subr.mxu1 %v1028_v2 }
  0xfc   : > { %907 = vmatpush3.msra.mxu1 %v1093_v3 }
  0xfd   : > { %908 = vmatprep.subr.mxu1 %v1028_v2 }
  0xfe   : > { %909 = vmatpush3.msra.mxu1 %v1103_v4 }
  0xff   : > { %910 = vmatprep.subr.mxu1 %v1028_v2 }
 0x100   : > { %911 = vmatpush3.msra.mxu1 %v1112_v5 }
 0x101   : > { %912 = vmatprep.subr.mxu1 %v1028_v2 }
 0x102   : > { %913 = vmatpush3.msra.mxu1 %v1121_v6 }
 0x103   : > { %914 = vmatprep.subr.mxu1 %v1028_v2 }
 0x104   : > { %915 = vmatpush3.msra.mxu1 %v1130_v7 }
 0x105   : > { %916 = vmatprep.subr.mxu1 %v1028_v2 }
 0x106   : > { %917 = vmatpush3.msra.mxu1 %v1139_v8 }
 0x107   : > { %918 = vmatprep.subr.mxu1 %v1028_v2 }
 0x108   : > { %919 = vmatpush3.msra.mxu1 %v1148_v9 }
 0x109   : > { %920 = vmatprep.subr.mxu1 %v1028_v2 }
 0x10a   : > { %921 = vmatpush3.msra.mxu1 %v1157_v10 }
 0x10b   : > { %922 = vmatprep.subr.mxu1 %v1028_v2 }
 0x10c   : > { %923 = vmatpush3.msra.mxu1 %v1166_v11 }
 0x10d   : > { %924 = vmatprep.subr.mxu1 %v1028_v2 }
 0x10e   : > { %925 = vmatpush3.msra.mxu1 %v1175_v12 }
 0x10f   : > { %926 = vmatprep.subr.mxu1 %v1028_v2 }
 0x110   : > { %927 = vmatpush3.msra.mxu1 %v1184_v13 }
 0x111   : > { %928 = vmatprep.subr.mxu1 %v1028_v2 }
 0x112   : > { %929 = vmatpush3.msra.mxu1 %v1193_v14 }
 0x113   : > { %930 = vmatprep.subr.mxu1 %v1028_v2 }
 0x114   : > { %931 = vmatpush3.msra.mxu1 %v1202_v15 }
 0x115   : > { %932 = vmatprep.subr.mxu1 %v1028_v2 }
 0x116   : > { %933 = vmatpush3.msra.mxu1 %v1211_v16 }
 0x117   : > { %934 = vmatprep.subr.mxu1 %v1028_v2 }
 0x118   : > { %935 = vmatpush3.msra.mxu1 %v1220_v17 }
 0x1b9   : > { %v384_v25 = vpop.f32.mrf.mxu1 }
 0x1ba   : > { %v388_v26 = vadd.f32 %v706_v24, %v384_v25 }
 0x1bb   : > { %v868_v27 = vpop.f32.mrf.mxu1 }
 0x1bc   : > { %v389_v28 = vmax.f32 %v388_v26, 0.0 }
 0x1be   : > { %902 = vmatmul.mubr.f32.vlgmr.msra.gmra.mxu0 %v389_v28 }
 0x27e   : > { %v458_v30 = vpop.f32.mrf.mxu0 }
 0x27f   : > { %v462_v31 = vadd.f32 %v707_v29, %v458_v30 }
 0x280   : > { %v903_v32 = vpop.f32.mrf.mxu0 }
 0x281   : > { %v463_v33 = vmax.f32 %v462_v31, 0.0 }
 0x283   : > { %937 = vmatmul.mubr.f32.vlgmr.msra.gmra.mxu1 %v463_v33 }
 0x343   : > { %v532_v35 = vpop.f32.mrf.mxu1 }
 0x344   : > { %v536_v36 = vadd.f32 %v708_v34, %v532_v35  ;;  %542 = sbr.rel (%p709_p6) target bundleno = 1070 (0x42e), region = 44 }
 0x345   : > { %v938_v37 = vpop.f32.mrf.mxu1 }
 0x346   : > { %v537_v38 = vmax.f32 %v536_v36, 0.0 }
 0x348   : > { %538 = vst [vmem:[#allocation2] sm:$0xff] %v537_v38 }
 0x349   : > { %v558_v39 = vld [vmem:[%s1370_s2 + $0x78] sm:$0xff]  ;;  %v1030_v40 = vmov 0.0   ;;  %v557_v41 = vld [vmem:[%s1370_s2 + $0x70] sm:$0xff]  ;;  %vm1031_vm1 = vmmov 0   ;;  %v556_v42 = vld [vmem:[%s1370_s2 + $0x68] sm:$0xff] }
 0x34a   : > { %939 = vmatprep.subr.mxu0 %v1030_v40  ;;  %971 = vmatprep.mubr.msk.f32.mxu0 %vm1031_vm1, %v1030_v40  ;;  %v555_v43 = vld [vmem:[%s1370_s2 + $0x60] sm:$0xff]  ;;  %v554_v44 = vld [vmem:[%s1370_s2 + $0x58] sm:$0xff]  ;;  %v553_v45 = vld [vmem:[%s1370_s2 + $0x50] sm:$0xff] }
 0x34b   : > { %940 = vmatpush3.msra.mxu0 %v558_v39  ;;  %v552_v46 = vld [vmem:[%s1370_s2 + $0x48] sm:$0xff]  ;;  %v551_v47 = vld [vmem:[%s1370_s2 + $0x40] sm:$0xff]  ;;  %v550_v48 = vld [vmem:[%s1370_s2 + $0x38] sm:$0xff] }
 0x34c   : > { %941 = vmatprep.subr.mxu0 %v1030_v40  ;;  %v549_v49 = vld [vmem:[%s1370_s2 + $0x30] sm:$0xff]  ;;  %v548_v50 = vld [vmem:[%s1370_s2 + $0x28] sm:$0xff]  ;;  %v547_v51 = vld [vmem:[%s1370_s2 + $0x20] sm:$0xff] }
 0x34d   : > { %942 = vmatpush3.msra.mxu0 %v557_v41  ;;  %v546_v52 = vld [vmem:[%s1370_s2 + $0x18] sm:$0xff]  ;;  %v545_v53 = vld [vmem:[%s1370_s2 + $0x10] sm:$0xff]  ;;  %v544_v54 = vld [vmem:[%s1370_s2 + $0x8] sm:$0xff] }
 0x34e   : > { %943 = vmatprep.subr.mxu0 %v1030_v40  ;;  %v543_v55 = vld [vmem:[%s1370_s2] sm:$0xff] }
 0x34f   : > { %944 = vmatpush3.msra.mxu0 %v556_v42  ;;  %v710_v56 = vld [vmem:[%s1371_s3] ss:$0 sm:$0xff] }
 0x350   : > { %945 = vmatprep.subr.mxu0 %v1030_v40 }
 0x351   : > { %946 = vmatpush3.msra.mxu0 %v555_v43 }
 0x352   : > { %947 = vmatprep.subr.mxu0 %v1030_v40 }
 0x353   : > { %948 = vmatpush3.msra.mxu0 %v554_v44 }
 0x354   : > { %949 = vmatprep.subr.mxu0 %v1030_v40 }
 0x355   : > { %950 = vmatpush3.msra.mxu0 %v553_v45 }
 0x356   : > { %951 = vmatprep.subr.mxu0 %v1030_v40 }
 0x357   : > { %952 = vmatpush3.msra.mxu0 %v552_v46 }
 0x358   : > { %953 = vmatprep.subr.mxu0 %v1030_v40 }
 0x359   : > { %954 = vmatpush3.msra.mxu0 %v551_v47 }
 0x35a   : > { %955 = vmatprep.subr.mxu0 %v1030_v40 }
 0x35b   : > { %956 = vmatpush3.msra.mxu0 %v550_v48 }
 0x35c   : > { %957 = vmatprep.subr.mxu0 %v1030_v40 }
 0x35d   : > { %958 = vmatpush3.msra.mxu0 %v549_v49 }
 0x35e   : > { %959 = vmatprep.subr.mxu0 %v1030_v40 }
 0x35f   : > { %960 = vmatpush3.msra.mxu0 %v548_v50 }
 0x360   : > { %961 = vmatprep.subr.mxu0 %v1030_v40 }
 0x361   : > { %962 = vmatpush3.msra.mxu0 %v547_v51 }
 0x362   : > { %963 = vmatprep.subr.mxu0 %v1030_v40 }
 0x363   : > { %964 = vmatpush3.msra.mxu0 %v546_v52 }
 0x364   : > { %965 = vmatprep.subr.mxu0 %v1030_v40 }
 0x365   : > { %966 = vmatpush3.msra.mxu0 %v545_v53 }
 0x366   : > { %967 = vmatprep.subr.mxu0 %v1030_v40 }
 0x367   : > { %968 = vmatpush3.msra.mxu0 %v544_v54 }
 0x368   : > { %969 = vmatprep.subr.mxu0 %v1030_v40 }
 0x369   : > { %970 = vmatpush3.msra.mxu0 %v543_v55 }
 0x36a   : > { %972 = vmatmul.mubr.f32.vlgmr.msra.gmra.mxu0 %v537_v38 }
 0x42a   : > { %v632_v57 = vpop.f32.mrf.mxu0 }
 0x42b   : > { %v633_v58 = vadd.f32 %v710_v56, %v632_v57 }
 0x42c   : > { %v973_v59 = vpop.f32.mrf.mxu0 }
 0x42d   : > { %636 = vst [vmem:[%s1372_s4] sm:$0xff] %v633_v58 }
 0x42e PF: > { %s14_s17 = sadd.s32 1, %s1025_s17   ;;  %s1373_s15 = smov %s1021_s16 }
 0x42f   : > { %p11_p7 = scmp.ge.s32.totalorder %s14_s17, 4   ;;  %s1374_s16 = smov %s1376_s18 }
 0x431   :  { %13 = sbr.rel (!%p11_p7) target bundleno = 2 (0x2), region = 77 }

</bundles_post_ra>
